<compile_context>
chip_gen: v6e
topology: v6e:2x2x1
jax: 0.10.0
libtpu: 0.0.40
codegen_flags: <defaults>
</compile_context>

<pallas_src>
import functools

import jax
import jax.numpy as jnp
import numpy as np
from jax.experimental import pallas as pl
from jax.experimental.pallas import tpu as pltpu  # noqa: F401  (TPU tuning hooks)

# ----------------------------- config ---------------------------------------
B = 2           # batch
N = 8           # sequence length (tokens)
C = 32          # embedding dim
NUM_HEADS = 4
HEAD_DIM = C // NUM_HEADS
MLP_RATIO = 4.0
HIDDEN = int(C * MLP_RATIO)
LN_EPS = 1e-5
INV_SQRT2 = 0.7071067811865476

# Packed-slab row layout (all rows lane-padded to 128):
#   0: ln1 weight   1: ln1 bias   2: proj bias   3: ln2 weight   4: ln2 bias
#   5: fc1 bias     6: fc2 bias   7: (pad)
#   8 .. 8+BN-1: additive cross-batch attention mask (0 within batch, -1e30 across)
_SLAB_PARAM_ROWS = 8


# ----------------------------- Pallas kernel --------------------------------
def block_kernel(num_heads,
                 x_ref, slab_ref, qkvw_ref, projw_ref, fc1w_ref, fc2w_ref,
                 out_ref):
    x = x_ref[...]                       # (B*N, C): all batches' tokens as rows
    rows, c = x.shape
    d = c // num_heads
    hidden = fc1w_ref.shape[1]

    # Static slices of the packed parameter slab (mask block starts at sublane 8,
    # a tile multiple; lane offsets are 0).
    ln1w = slab_ref[0:1, 0:c]
    ln1b = slab_ref[1:2, 0:c]
    projb = slab_ref[2:3, 0:c]
    ln2w = slab_ref[3:4, 0:c]
    ln2b = slab_ref[4:5, 0:c]
    fc1b = slab_ref[5:6, 0:hidden]
    fc2b = slab_ref[6:7, 0:c]
    bias = slab_ref[_SLAB_PARAM_ROWS:_SLAB_PARAM_ROWS + rows, 0:rows]   # (BN, BN)

    def layernorm(h, w, b):
        mu = jnp.mean(h, axis=-1, keepdims=True)
        diff = h - mu
        var = jnp.mean(diff * diff, axis=-1, keepdims=True)
        return diff * jax.lax.rsqrt(var + LN_EPS) * w + b

    # ---- Attention branch: LN1 -> qkv -> masked per-head softmax(QK^T)V ----
    h1 = layernorm(x, ln1w, ln1b)
    # 1/sqrt(d) is already folded into qkvw's q-columns (done once, wrapper-side).
    qkv = jnp.dot(h1, qkvw_ref[...], preferred_element_type=jnp.float32)  # (BN, 3C)
    q = qkv[:, 0 * c:1 * c]
    k = qkv[:, 1 * c:2 * c]
    v = qkv[:, 2 * c:3 * c]

    # Per-head attention over ALL batch rows at once; cross-batch positions are
    # killed by the precomputed -1e30 additive mask.  Head outputs are
    # lane-concatenated and projected with a single K=C matmul (better for the
    # v5e/v6e MRF result path than 4 accumulated K=8 matmuls; on v7x the
    # accumulate-into-MRB form would be roughly equivalent).
    head_outs = []
    for h in range(num_heads):           # static unrolled; H=4
        lo, hi = h * d, (h + 1) * d
        s = jnp.dot(q[:, lo:hi], k[:, lo:hi].T,
                    preferred_element_type=jnp.float32) + bias            # (BN, BN)
        s = s - jnp.max(s, axis=-1, keepdims=True)
        p = jnp.exp(s)                                                    # masked -> 0
        l = jnp.sum(p, axis=-1, keepdims=True)
        oh = jnp.dot(p, v[:, lo:hi], preferred_element_type=jnp.float32) / l
        head_outs.append(oh)                                              # (BN, D)
    attn = jnp.concatenate(head_outs, axis=-1)                            # (BN, C)
    x1 = x + jnp.dot(attn, projw_ref[...],
                     preferred_element_type=jnp.float32) + projb          # residual 1

    # ---- MLP branch: LN2 -> fc1 -> GELU(exact erf) -> fc2 ----
    h2 = layernorm(x1, ln2w, ln2b)
    hid = jnp.dot(h2, fc1w_ref[...],
                  preferred_element_type=jnp.float32) + fc1b              # (BN, HIDDEN)
    hid = 0.5 * hid * (1.0 + jax.lax.erf(hid * INV_SQRT2))                # exact GELU
    mlp = jnp.dot(hid, fc2w_ref[...],
                  preferred_element_type=jnp.float32) + fc2b
    out_ref[...] = x1 + mlp                                               # residual 2


# ----------------------------- host-side param packing -----------------------
def pack_params(params, b, n):
    """One-time host-side prep (pure numpy): pack all tiny vectors plus the
    cross-batch attention mask into a single (8 + pad(BN), 128) f32 slab, and
    fold the 1/sqrt(d) attention scale into the q-columns of qkvw."""
    (ln1w, ln1b, qkvw, projw, projb, ln2w, ln2b, fc1w, fc1b, fc2w, fc2b) = params
    c = qkvw.shape[0]
    hidden = fc1w.shape[1]
    bn = b * n
    assert c <= 128 and hidden <= 128 and bn <= 128, "slab layout assumes <=128 lanes"

    mask_rows = -(-bn // 8) * 8                       # pad BN up to a sublane multiple
    slab = np.zeros((_SLAB_PARAM_ROWS + mask_rows, 128), np.float32)
    slab[0, :c] = np.array(ln1w, np.float32).reshape(-1)
    slab[1, :c] = np.array(ln1b, np.float32).reshape(-1)
    slab[2, :c] = np.array(projb, np.float32).reshape(-1)
    slab[3, :c] = np.array(ln2w, np.float32).reshape(-1)
    slab[4, :c] = np.array(ln2b, np.float32).reshape(-1)
    slab[5, :hidden] = np.array(fc1b, np.float32).reshape(-1)
    slab[6, :c] = np.array(fc2b, np.float32).reshape(-1)
    tok_batch = np.arange(bn) // n
    slab[_SLAB_PARAM_ROWS:_SLAB_PARAM_ROWS + bn, :bn] = np.where(
        tok_batch[:, None] == tok_batch[None, :], 0.0, -1e30).astype(np.float32)

    head_dim = c // NUM_HEADS
    qkvw_scaled = np.array(qkvw, np.float32)
    qkvw_scaled[:, :c] *= head_dim ** -0.5            # fold softmax scale into q

    return (jnp.asarray(slab), jnp.asarray(qkvw_scaled),
            jnp.asarray(projw), jnp.asarray(fc1w), jnp.asarray(fc2w))


# ----------------------------- wrapper ---------------------------------------
@jax.jit
def vit_block(x, slab, qkvw, projw, fc1w, fc2w):
    b, n, c = x.shape
    xf = x.reshape(b * n, c)              # flatten batch into rows (free, fused by jit)
    out = pl.pallas_call(
        functools.partial(block_kernel, NUM_HEADS),
        out_shape=jax.ShapeDtypeStruct((b * n, c), jnp.float32),
        # No grid / BlockSpecs: single invocation, every operand lives whole in
        # VMEM (~60 KiB total — far under any generation's limit).
        # TODO(synk): if B*N ever grows past the per-step overhead, split rows
        # over a ("parallel",) grid so v7x's second TensorCore is used.
    )(xf, slab, qkvw, projw, fc1w, fc2w)
    return out.reshape(b, n, c)


# ----------------------------- pure-JAX reference ----------------------------
def vit_block_ref(x, params):
    (ln1w, ln1b, qkvw, projw, projb, ln2w, ln2b, fc1w, fc1b, fc2w, fc2b) = params

    def ln(h, w, b):
        mu = jnp.mean(h, axis=-1, keepdims=True)
        var = jnp.mean((h - mu) ** 2, axis=-1, keepdims=True)
        return (h - mu) / jnp.sqrt(var + LN_EPS) * w + b

    bsz, n, c = x.shape
    h1 = ln(x, ln1w, ln1b)
    qkv = h1 @ qkvw                                   # (B, N, 3C)
    qkv = qkv.reshape(bsz, n, 3, NUM_HEADS, HEAD_DIM).transpose(2, 0, 3, 1, 4)
    q, k, v = qkv[0], qkv[1], qkv[2]                  # (B, H, N, D)
    attn = (q @ k.transpose(0, 1, 3, 2)) * (HEAD_DIM ** -0.5)
    attn = jax.nn.softmax(attn, axis=-1)
    o = (attn @ v).transpose(0, 2, 1, 3).reshape(bsz, n, c)
    o = o @ projw + projb
    x1 = x + o
    h2 = ln(x1, ln2w, ln2b)
    hid = jax.nn.gelu(h2 @ fc1w + fc1b, approximate=False)
    return x1 + (hid @ fc2w + fc2b)


# ----------------------------- main ------------------------------------------
if __name__ == "__main__":
    key = jax.random.PRNGKey(0)
    keys = jax.random.split(key, 8)

    x = jax.random.normal(keys[0], (B, N, C), dtype=jnp.float32)

    # Deterministic synthetic parameters (PyTorch Linear = y = x W^T + b;
    # weights stored already transposed to (in, out)).
    ln1w = jnp.ones((1, C), jnp.float32)
    ln1b = jnp.zeros((1, C), jnp.float32)
    qkvw = 0.05 * jax.random.normal(keys[1], (C, 3 * C), jnp.float32)  # qkv_bias=False
    projw = 0.05 * jax.random.normal(keys[2], (C, C), jnp.float32)
    projb = 0.01 * jax.random.normal(keys[3], (1, C), jnp.float32)
    ln2w = jnp.ones((1, C), jnp.float32)
    ln2b = jnp.zeros((1, C), jnp.float32)
    fc1w = 0.05 * jax.random.normal(keys[4], (C, HIDDEN), jnp.float32)
    fc1b = 0.01 * jax.random.normal(keys[5], (1, HIDDEN), jnp.float32)
    fc2w = 0.05 * jax.random.normal(keys[6], (HIDDEN, C), jnp.float32)
    fc2b = 0.01 * jax.random.normal(keys[7], (1, C), jnp.float32)

    params = (ln1w, ln1b, qkvw, projw, projb, ln2w, ln2b, fc1w, fc1b, fc2w, fc2b)
    packed = pack_params(params, B, N)                # one-time host-side prep

    out = jax.block_until_ready(vit_block(x, *packed))
    # Reference at "highest" matmul precision so both sides are true f32.
    with jax.default_matmul_precision("highest"):
        ref = jax.block_until_ready(vit_block_ref(x, params))

    # Approximate reciprocal dropped -> tolerance tightened (was 2e-3).
    np.testing.assert_allclose(np.asarray(out), np.asarray(ref),
                               rtol=5e-4, atol=5e-4)
    print("KERNEL_OK")
</pallas_src>

<mosaic_0001>
module attributes {stable_mosaic.version = 11 : i64} {
  func.func @block_kernel(%arg0: memref<16x32xf32, #tpu.memory_space<vmem>>, %arg1: memref<24x128xf32, #tpu.memory_space<vmem>>, %arg2: memref<32x96xf32, #tpu.memory_space<vmem>>, %arg3: memref<32x32xf32, #tpu.memory_space<vmem>>, %arg4: memref<32x128xf32, #tpu.memory_space<vmem>>, %arg5: memref<128x32xf32, #tpu.memory_space<vmem>>, %arg6: memref<16x32xf32, #tpu.memory_space<vmem>>) attributes {dimension_semantics = [], scalar_prefetch = 0 : i64, scratch_operands = 0 : i64, tpu.core_type = #tpu.core_type<tc>} {
    %c0 = arith.constant 0 : index
    %c0_0 = arith.constant 0 : index
    %0 = vector.load %arg0[%c0, %c0_0] : memref<16x32xf32, #tpu.memory_space<vmem>>, vector<16x32xf32>
    %c0_1 = arith.constant 0 : index
    %c0_2 = arith.constant 0 : index
    %1 = vector.load %arg1[%c0_1, %c0_2] : memref<24x128xf32, #tpu.memory_space<vmem>>, vector<1x32xf32>
    %c1 = arith.constant 1 : index
    %c0_3 = arith.constant 0 : index
    %2 = vector.load %arg1[%c1, %c0_3] : memref<24x128xf32, #tpu.memory_space<vmem>>, vector<1x32xf32>
    %c2 = arith.constant 2 : index
    %c0_4 = arith.constant 0 : index
    %3 = vector.load %arg1[%c2, %c0_4] : memref<24x128xf32, #tpu.memory_space<vmem>>, vector<1x32xf32>
    %c3 = arith.constant 3 : index
    %c0_5 = arith.constant 0 : index
    %4 = vector.load %arg1[%c3, %c0_5] : memref<24x128xf32, #tpu.memory_space<vmem>>, vector<1x32xf32>
    %c4 = arith.constant 4 : index
    %c0_6 = arith.constant 0 : index
    %5 = vector.load %arg1[%c4, %c0_6] : memref<24x128xf32, #tpu.memory_space<vmem>>, vector<1x32xf32>
    %c5 = arith.constant 5 : index
    %c0_7 = arith.constant 0 : index
    %6 = vector.load %arg1[%c5, %c0_7] : memref<24x128xf32, #tpu.memory_space<vmem>>, vector<1x128xf32>
    %c6 = arith.constant 6 : index
    %c0_8 = arith.constant 0 : index
    %7 = vector.load %arg1[%c6, %c0_8] : memref<24x128xf32, #tpu.memory_space<vmem>>, vector<1x32xf32>
    %c8 = arith.constant 8 : index
    %c0_9 = arith.constant 0 : index
    %8 = vector.load %arg1[%c8, %c0_9] : memref<24x128xf32, #tpu.memory_space<vmem>>, vector<16x16xf32>
    %cst = arith.constant dense<0.000000e+00> : vector<16xf32>
    %9 = vector.multi_reduction <add>, %0, %cst [1] : vector<16x32xf32> to vector<16xf32>
    %10 = vector.shape_cast %9 : vector<16xf32> to vector<16x1xf32>
    %cst_10 = arith.constant 3.200000e+01 : f32
    %11 = vector.broadcast %cst_10 : f32 to vector<16x1xf32>
    %12 = arith.divf %10, %11 : vector<16x1xf32>
    %13 = vector.broadcast %12 : vector<16x1xf32> to vector<16x32xf32>
    %14 = arith.subf %0, %13 : vector<16x32xf32>
    %15 = arith.mulf %14, %14 : vector<16x32xf32>
    %cst_11 = arith.constant dense<0.000000e+00> : vector<16xf32>
    %16 = vector.multi_reduction <add>, %15, %cst_11 [1] : vector<16x32xf32> to vector<16xf32>
    %17 = vector.shape_cast %16 : vector<16xf32> to vector<16x1xf32>
    %cst_12 = arith.constant 3.200000e+01 : f32
    %18 = vector.broadcast %cst_12 : f32 to vector<16x1xf32>
    %19 = arith.divf %17, %18 : vector<16x1xf32>
    %cst_13 = arith.constant 9.99999974E-6 : f32
    %20 = vector.broadcast %cst_13 : f32 to vector<16x1xf32>
    %21 = arith.addf %19, %20 : vector<16x1xf32>
    %22 = math.rsqrt %21 : vector<16x1xf32>
    %23 = vector.broadcast %22 : vector<16x1xf32> to vector<16x32xf32>
    %24 = arith.mulf %14, %23 : vector<16x32xf32>
    %25 = vector.broadcast %1 : vector<1x32xf32> to vector<16x32xf32>
    %26 = arith.mulf %24, %25 : vector<16x32xf32>
    %27 = vector.broadcast %2 : vector<1x32xf32> to vector<16x32xf32>
    %28 = arith.addf %26, %27 : vector<16x32xf32>
    %c0_14 = arith.constant 0 : index
    %c0_15 = arith.constant 0 : index
    %29 = vector.load %arg2[%c0_14, %c0_15] : memref<32x96xf32, #tpu.memory_space<vmem>>, vector<32x96xf32>
    %cst_16 = arith.constant dense<0.000000e+00> : vector<16x96xf32>
    %30 = tpu.matmul %28, %29, %cst_16 {dimension_numbers = #tpu.dot_dimension_numbers<[1], [0], [0], [1], [0, 0, 1, 1], [], []>} : vector<16x32xf32>, vector<32x96xf32>, vector<16x96xf32> -> vector<16x96xf32>
    %31 = vector.extract_strided_slice %30 {offsets = [0, 0], sizes = [16, 32], strides = [1, 1]} : vector<16x96xf32> to vector<16x32xf32>
    %32 = vector.extract_strided_slice %30 {offsets = [0, 32], sizes = [16, 32], strides = [1, 1]} : vector<16x96xf32> to vector<16x32xf32>
    %33 = vector.extract_strided_slice %30 {offsets = [0, 64], sizes = [16, 32], strides = [1, 1]} : vector<16x96xf32> to vector<16x32xf32>
    %34 = vector.extract_strided_slice %31 {offsets = [0, 0], sizes = [16, 8], strides = [1, 1]} : vector<16x32xf32> to vector<16x8xf32>
    %35 = vector.extract_strided_slice %32 {offsets = [0, 0], sizes = [16, 8], strides = [1, 1]} : vector<16x32xf32> to vector<16x8xf32>
    %36 = tpu.transpose %35, [1, 0] : vector<16x8xf32> -> vector<8x16xf32>
    %cst_17 = arith.constant dense<0.000000e+00> : vector<16x16xf32>
    %37 = tpu.matmul %34, %36, %cst_17 {dimension_numbers = #tpu.dot_dimension_numbers<[1], [0], [0], [1], [0, 0, 1, 1], [], []>} : vector<16x8xf32>, vector<8x16xf32>, vector<16x16xf32> -> vector<16x16xf32>
    %38 = arith.addf %37, %8 : vector<16x16xf32>
    %cst_18 = arith.constant dense<0xFF800000> : vector<16xf32>
    %39 = vector.multi_reduction <maximumf>, %38, %cst_18 [1] : vector<16x16xf32> to vector<16xf32>
    %40 = vector.shape_cast %39 : vector<16xf32> to vector<16x1xf32>
    %41 = vector.broadcast %40 : vector<16x1xf32> to vector<16x16xf32>
    %42 = arith.subf %38, %41 : vector<16x16xf32>
    %43 = math.exp %42 : vector<16x16xf32>
    %cst_19 = arith.constant dense<0.000000e+00> : vector<16xf32>
    %44 = vector.multi_reduction <add>, %43, %cst_19 [1] : vector<16x16xf32> to vector<16xf32>
    %45 = vector.shape_cast %44 : vector<16xf32> to vector<16x1xf32>
    %46 = vector.extract_strided_slice %33 {offsets = [0, 0], sizes = [16, 8], strides = [1, 1]} : vector<16x32xf32> to vector<16x8xf32>
    %cst_20 = arith.constant dense<0.000000e+00> : vector<16x8xf32>
    %47 = tpu.matmul %43, %46, %cst_20 {dimension_numbers = #tpu.dot_dimension_numbers<[1], [0], [0], [1], [0, 0, 1, 1], [], []>} : vector<16x16xf32>, vector<16x8xf32>, vector<16x8xf32> -> vector<16x8xf32>
    %48 = vector.broadcast %45 : vector<16x1xf32> to vector<16x8xf32>
    %49 = arith.divf %47, %48 : vector<16x8xf32>
    %50 = vector.extract_strided_slice %31 {offsets = [0, 8], sizes = [16, 8], strides = [1, 1]} : vector<16x32xf32> to vector<16x8xf32>
    %51 = vector.extract_strided_slice %32 {offsets = [0, 8], sizes = [16, 8], strides = [1, 1]} : vector<16x32xf32> to vector<16x8xf32>
    %52 = tpu.transpose %51, [1, 0] : vector<16x8xf32> -> vector<8x16xf32>
    %cst_21 = arith.constant dense<0.000000e+00> : vector<16x16xf32>
    %53 = tpu.matmul %50, %52, %cst_21 {dimension_numbers = #tpu.dot_dimension_numbers<[1], [0], [0], [1], [0, 0, 1, 1], [], []>} : vector<16x8xf32>, vector<8x16xf32>, vector<16x16xf32> -> vector<16x16xf32>
    %54 = arith.addf %53, %8 : vector<16x16xf32>
    %cst_22 = arith.constant dense<0xFF800000> : vector<16xf32>
    %55 = vector.multi_reduction <maximumf>, %54, %cst_22 [1] : vector<16x16xf32> to vector<16xf32>
    %56 = vector.shape_cast %55 : vector<16xf32> to vector<16x1xf32>
    %57 = vector.broadcast %56 : vector<16x1xf32> to vector<16x16xf32>
    %58 = arith.subf %54, %57 : vector<16x16xf32>
    %59 = math.exp %58 : vector<16x16xf32>
    %cst_23 = arith.constant dense<0.000000e+00> : vector<16xf32>
    %60 = vector.multi_reduction <add>, %59, %cst_23 [1] : vector<16x16xf32> to vector<16xf32>
    %61 = vector.shape_cast %60 : vector<16xf32> to vector<16x1xf32>
    %62 = vector.extract_strided_slice %33 {offsets = [0, 8], sizes = [16, 8], strides = [1, 1]} : vector<16x32xf32> to vector<16x8xf32>
    %cst_24 = arith.constant dense<0.000000e+00> : vector<16x8xf32>
    %63 = tpu.matmul %59, %62, %cst_24 {dimension_numbers = #tpu.dot_dimension_numbers<[1], [0], [0], [1], [0, 0, 1, 1], [], []>} : vector<16x16xf32>, vector<16x8xf32>, vector<16x8xf32> -> vector<16x8xf32>
    %64 = vector.broadcast %61 : vector<16x1xf32> to vector<16x8xf32>
    %65 = arith.divf %63, %64 : vector<16x8xf32>
    %66 = vector.extract_strided_slice %31 {offsets = [0, 16], sizes = [16, 8], strides = [1, 1]} : vector<16x32xf32> to vector<16x8xf32>
    %67 = vector.extract_strided_slice %32 {offsets = [0, 16], sizes = [16, 8], strides = [1, 1]} : vector<16x32xf32> to vector<16x8xf32>
    %68 = tpu.transpose %67, [1, 0] : vector<16x8xf32> -> vector<8x16xf32>
    %cst_25 = arith.constant dense<0.000000e+00> : vector<16x16xf32>
    %69 = tpu.matmul %66, %68, %cst_25 {dimension_numbers = #tpu.dot_dimension_numbers<[1], [0], [0], [1], [0, 0, 1, 1], [], []>} : vector<16x8xf32>, vector<8x16xf32>, vector<16x16xf32> -> vector<16x16xf32>
    %70 = arith.addf %69, %8 : vector<16x16xf32>
    %cst_26 = arith.constant dense<0xFF800000> : vector<16xf32>
    %71 = vector.multi_reduction <maximumf>, %70, %cst_26 [1] : vector<16x16xf32> to vector<16xf32>
    %72 = vector.shape_cast %71 : vector<16xf32> to vector<16x1xf32>
    %73 = vector.broadcast %72 : vector<16x1xf32> to vector<16x16xf32>
    %74 = arith.subf %70, %73 : vector<16x16xf32>
    %75 = math.exp %74 : vector<16x16xf32>
    %cst_27 = arith.constant dense<0.000000e+00> : vector<16xf32>
    %76 = vector.multi_reduction <add>, %75, %cst_27 [1] : vector<16x16xf32> to vector<16xf32>
    %77 = vector.shape_cast %76 : vector<16xf32> to vector<16x1xf32>
    %78 = vector.extract_strided_slice %33 {offsets = [0, 16], sizes = [16, 8], strides = [1, 1]} : vector<16x32xf32> to vector<16x8xf32>
    %cst_28 = arith.constant dense<0.000000e+00> : vector<16x8xf32>
    %79 = tpu.matmul %75, %78, %cst_28 {dimension_numbers = #tpu.dot_dimension_numbers<[1], [0], [0], [1], [0, 0, 1, 1], [], []>} : vector<16x16xf32>, vector<16x8xf32>, vector<16x8xf32> -> vector<16x8xf32>
    %80 = vector.broadcast %77 : vector<16x1xf32> to vector<16x8xf32>
    %81 = arith.divf %79, %80 : vector<16x8xf32>
    %82 = vector.extract_strided_slice %31 {offsets = [0, 24], sizes = [16, 8], strides = [1, 1]} : vector<16x32xf32> to vector<16x8xf32>
    %83 = vector.extract_strided_slice %32 {offsets = [0, 24], sizes = [16, 8], strides = [1, 1]} : vector<16x32xf32> to vector<16x8xf32>
    %84 = tpu.transpose %83, [1, 0] : vector<16x8xf32> -> vector<8x16xf32>
    %cst_29 = arith.constant dense<0.000000e+00> : vector<16x16xf32>
    %85 = tpu.matmul %82, %84, %cst_29 {dimension_numbers = #tpu.dot_dimension_numbers<[1], [0], [0], [1], [0, 0, 1, 1], [], []>} : vector<16x8xf32>, vector<8x16xf32>, vector<16x16xf32> -> vector<16x16xf32>
    %86 = arith.addf %85, %8 : vector<16x16xf32>
    %cst_30 = arith.constant dense<0xFF800000> : vector<16xf32>
    %87 = vector.multi_reduction <maximumf>, %86, %cst_30 [1] : vector<16x16xf32> to vector<16xf32>
    %88 = vector.shape_cast %87 : vector<16xf32> to vector<16x1xf32>
    %89 = vector.broadcast %88 : vector<16x1xf32> to vector<16x16xf32>
    %90 = arith.subf %86, %89 : vector<16x16xf32>
    %91 = math.exp %90 : vector<16x16xf32>
    %cst_31 = arith.constant dense<0.000000e+00> : vector<16xf32>
    %92 = vector.multi_reduction <add>, %91, %cst_31 [1] : vector<16x16xf32> to vector<16xf32>
    %93 = vector.shape_cast %92 : vector<16xf32> to vector<16x1xf32>
    %94 = vector.extract_strided_slice %33 {offsets = [0, 24], sizes = [16, 8], strides = [1, 1]} : vector<16x32xf32> to vector<16x8xf32>
    %cst_32 = arith.constant dense<0.000000e+00> : vector<16x8xf32>
    %95 = tpu.matmul %91, %94, %cst_32 {dimension_numbers = #tpu.dot_dimension_numbers<[1], [0], [0], [1], [0, 0, 1, 1], [], []>} : vector<16x16xf32>, vector<16x8xf32>, vector<16x8xf32> -> vector<16x8xf32>
    %96 = vector.broadcast %93 : vector<16x1xf32> to vector<16x8xf32>
    %97 = arith.divf %95, %96 : vector<16x8xf32>
    %98 = tpu.concatenate %49, %65, %81, %97 in 1 : vector<16x8xf32>, vector<16x8xf32>, vector<16x8xf32>, vector<16x8xf32> -> vector<16x32xf32>
    %c0_33 = arith.constant 0 : index
    %c0_34 = arith.constant 0 : index
    %99 = vector.load %arg3[%c0_33, %c0_34] : memref<32x32xf32, #tpu.memory_space<vmem>>, vector<32x32xf32>
    %cst_35 = arith.constant dense<0.000000e+00> : vector<16x32xf32>
    %100 = tpu.matmul %98, %99, %cst_35 {dimension_numbers = #tpu.dot_dimension_numbers<[1], [0], [0], [1], [0, 0, 1, 1], [], []>} : vector<16x32xf32>, vector<32x32xf32>, vector<16x32xf32> -> vector<16x32xf32>
    %101 = arith.addf %0, %100 : vector<16x32xf32>
    %102 = vector.broadcast %3 : vector<1x32xf32> to vector<16x32xf32>
    %103 = arith.addf %101, %102 : vector<16x32xf32>
    %cst_36 = arith.constant dense<0.000000e+00> : vector<16xf32>
    %104 = vector.multi_reduction <add>, %103, %cst_36 [1] : vector<16x32xf32> to vector<16xf32>
    %105 = vector.shape_cast %104 : vector<16xf32> to vector<16x1xf32>
    %cst_37 = arith.constant 3.200000e+01 : f32
    %106 = vector.broadcast %cst_37 : f32 to vector<16x1xf32>
    %107 = arith.divf %105, %106 : vector<16x1xf32>
    %108 = vector.broadcast %107 : vector<16x1xf32> to vector<16x32xf32>
    %109 = arith.subf %103, %108 : vector<16x32xf32>
    %110 = arith.mulf %109, %109 : vector<16x32xf32>
    %cst_38 = arith.constant dense<0.000000e+00> : vector<16xf32>
    %111 = vector.multi_reduction <add>, %110, %cst_38 [1] : vector<16x32xf32> to vector<16xf32>
    %112 = vector.shape_cast %111 : vector<16xf32> to vector<16x1xf32>
    %cst_39 = arith.constant 3.200000e+01 : f32
    %113 = vector.broadcast %cst_39 : f32 to vector<16x1xf32>
    %114 = arith.divf %112, %113 : vector<16x1xf32>
    %cst_40 = arith.constant 9.99999974E-6 : f32
    %115 = vector.broadcast %cst_40 : f32 to vector<16x1xf32>
    %116 = arith.addf %114, %115 : vector<16x1xf32>
    %117 = math.rsqrt %116 : vector<16x1xf32>
    %118 = vector.broadcast %117 : vector<16x1xf32> to vector<16x32xf32>
    %119 = arith.mulf %109, %118 : vector<16x32xf32>
    %120 = vector.broadcast %4 : vector<1x32xf32> to vector<16x32xf32>
    %121 = arith.mulf %119, %120 : vector<16x32xf32>
    %122 = vector.broadcast %5 : vector<1x32xf32> to vector<16x32xf32>
    %123 = arith.addf %121, %122 : vector<16x32xf32>
    %c0_41 = arith.constant 0 : index
    %c0_42 = arith.constant 0 : index
    %124 = vector.load %arg4[%c0_41, %c0_42] : memref<32x128xf32, #tpu.memory_space<vmem>>, vector<32x128xf32>
    %cst_43 = arith.constant dense<0.000000e+00> : vector<16x128xf32>
    %125 = tpu.matmul %123, %124, %cst_43 {dimension_numbers = #tpu.dot_dimension_numbers<[1], [0], [0], [1], [0, 0, 1, 1], [], []>} : vector<16x32xf32>, vector<32x128xf32>, vector<16x128xf32> -> vector<16x128xf32>
    %126 = vector.broadcast %6 : vector<1x128xf32> to vector<16x128xf32>
    %127 = arith.addf %125, %126 : vector<16x128xf32>
    %cst_44 = arith.constant 5.000000e-01 : f32
    %128 = vector.broadcast %cst_44 : f32 to vector<16x128xf32>
    %129 = arith.mulf %128, %127 : vector<16x128xf32>
    %cst_45 = arith.constant 0.707106769 : f32
    %130 = vector.broadcast %cst_45 : f32 to vector<16x128xf32>
    %131 = arith.mulf %127, %130 : vector<16x128xf32>
    %132 = math.erf %131 : vector<16x128xf32>
    %cst_46 = arith.constant 1.000000e+00 : f32
    %133 = vector.broadcast %cst_46 : f32 to vector<16x128xf32>
    %134 = arith.addf %133, %132 : vector<16x128xf32>
    %135 = arith.mulf %129, %134 : vector<16x128xf32>
    %c0_47 = arith.constant 0 : index
    %c0_48 = arith.constant 0 : index
    %136 = vector.load %arg5[%c0_47, %c0_48] : memref<128x32xf32, #tpu.memory_space<vmem>>, vector<128x32xf32>
    %cst_49 = arith.constant dense<0.000000e+00> : vector<16x32xf32>
    %137 = tpu.matmul %135, %136, %cst_49 {dimension_numbers = #tpu.dot_dimension_numbers<[1], [0], [0], [1], [0, 0, 1, 1], [], []>} : vector<16x128xf32>, vector<128x32xf32>, vector<16x32xf32> -> vector<16x32xf32>
    %138 = vector.broadcast %7 : vector<1x32xf32> to vector<16x32xf32>
    %139 = arith.addf %137, %138 : vector<16x32xf32>
    %140 = arith.addf %103, %139 : vector<16x32xf32>
    %c0_50 = arith.constant 0 : index
    %c0_51 = arith.constant 0 : index
    %141 = vector.load %arg6[%c0_50, %c0_51] : memref<16x32xf32, #tpu.memory_space<vmem>>, vector<16x32xf32>
    tpu.vector_store %arg6[%c0_50, %c0_51], %140 {strides = array<i32>} : memref<16x32xf32, #tpu.memory_space<vmem>>, vector<16x32xf32>,
    return
  }
}

</mosaic_0001>

<bundles_post_ra>
// kernel: vit_block.1
= control target key start
LH: loop header
LB: loop body
LE: loop exit
PB: predicated region body
PF: predicated region fallthrough
CT: control target
= control target key end

     0   :  { %vm35_vm0 = vcmask 261120   ;;  %s1963_s0 = inlined_call_operand.vmem [shape: f32[16,32], index: 0, kind: input, shape index: {}]   ;;  %s1964_s1 = inlined_call_operand.vmem [shape: f32[24,128], index: 1, kind: input, shape index: {}]   ;;  %s1965_s2 = inlined_call_operand.vmem [shape: f32[32,96], index: 2, kind: input, shape index: {}]   ;;  %s1966_s3 = inlined_call_operand.vmem [shape: f32[32,32], index: 3, kind: input, shape index: {}]   ;;  %s1967_s4 = inlined_call_operand.vmem [shape: f32[32,128], index: 4, kind: input, shape index: {}]   ;;  %s1968_s5 = inlined_call_operand.vmem [shape: f32[128,32], index: 5, kind: input, shape index: {}]   ;;  %s1969_s6 = inlined_call_operand.hbm [shape: f32[16,32], index: 6, kind: output, shape index: {}]  }
   0x1   :  { %v1701_v0 = vld [vmem:[%s1963_s0] sm:$0xff]  ;;  %v1706_v1 = vld [vmem:[%s1963_s0 + $0x8] sm:$0xff] }
   0x2   :  { %11 = vsyncpa [#allocation3], 0  ;;  %v36_v2 = vsel %vm35_vm0, %v1701_v0, 0.0  ;;  %v39_v3 = vsel %vm35_vm0, %v1706_v1, 0.0  ;;  %v78_v14 = vld [vmem:[%s1965_s2 + $0x18] sm:$0xff]  ;;  %v77_v15 = vld [vmem:[%s1965_s2 + $0x10] sm:$0xff] }
   0x3   :  { %37 = vadd.xlane.f32.xlu0 %v36_v2  ;;  %1441 = vmatprep.subr.mxu1 %v78_v14  ;;  %v76_v16 = vld [vmem:[%s1965_s2 + $0x8] sm:$0xff]  ;;  %v75_v17 = vld [vmem:[%s1965_s2] sm:$0xff]  ;;  %vm166_vm1 = vcmask 64512   ;;  %s1647_s2 = smov 96   ;;  %s1648_s12 = smov 120   ;;  %v1775_v52 = vld [vmem:[%s1964_s1 + $0x10] sm:$0xff] }
   0x4   :  { %1442 = vmatpush3.msra.mxu1 %v78_v14  ;;  %v1336_v25 = vld [vmem:[%s1964_s1] ss:$0 sm:$0xff]  ;;  %v1337_v27 = vld [vmem:[%s1964_s1 + $0x1] ss:$0 sm:$0xff]  ;;  %s1649_s13 = smov 88   ;;  %s1650_s14 = smov 112  }
   0x5   :  { %1443 = vmatprep.subr.mxu1 %v77_v15  ;;  %s1651_s15 = smov 80   ;;  %s1652_s16 = smov 48   ;;  %v1781_v55 = vld [vmem:[%s1964_s1 + $0x8] sm:$0xff]  ;;  %vm250_vm2 = vcmask 130048   ;;  %vm988_vm3 = vcmask 195584  }
   0x6   :  { %1444 = vmatpush3.msra.mxu1 %v77_v15  ;;  %s1653_s21 = smov 72   ;;  %s1654_s22 = smov 104  }
   0x7   :  { %40 = vadd.xlane.f32.xlu0 %v39_v3  ;;  %1445 = vmatprep.subr.mxu1 %v76_v16  ;;  %s1655_s23 = smov 64   ;;  %s1656_s24 = smov 56  }
   0x8   :  { %1446 = vmatpush3.msra.mxu1 %v76_v16  ;;  %s1657_s0 = smov 40   ;;  %s1658_s25 = smov 8  }
   0x9   :  { %1447 = vmatprep.subr.mxu1 %v75_v17  ;;  %s1659_s26 = smov 16   ;;  %s1660_s11 = smov 24  }
   0xa   :  { %1448 = vmatpush3.msra.mxu1 %v75_v17  ;;  %s1661_s7 = smov [#allocation2]  }
   0xb   :  { %s1325_s8 = sshll.u32 %s1661_s7, 4  ;;  %s1326_s8 = int_to_ptr.vmem [resolvable:$true] %s1325_s8 }
   0xc   :  { %s1625_s9 = scalar_lea.vmem %s1326_s8, 256  ;;  %p1630_p1 = scmp.lt.s32.totalorder %s1326_s8, %s1326_s8 }
   0xd   :  { %p1626_p0 = scmp.ne.s32.totalorder %s1326_s8, %s1625_s9  ;;  %p1631_p2 = scmp.lt.s32.totalorder %s1625_s9, %s1625_s9 }
   0xf   :  { %p1632_p3 = por %p1631_p2, %p1630_p1 }
  0x11   :  { %p1633_p4 = pnand %p1632_p3, %p1626_p0 }
  0x8c   :  { %v38_v4 = vpop.xlane.xlu0 %37 }
  0x8d   :  { %v43_v5 = vmul.f32 0.03125, %v38_v4 }
  0x8f   :  { %v45_v6 = vsub.f32 %v1701_v0, %v43_v5 }
  0x90   :  { %v41_v7 = vpop.xlane.xlu0 %40 }
  0x91   :  { %v44_v8 = vmul.f32 0.03125, %v41_v7  ;;  %v47_v9 = vmul.f32 %v45_v6, %v45_v6 }
  0x93   :  { %v46_v10 = vsub.f32 %v1706_v1, %v44_v8  ;;  %v49_v11 = vsel %vm35_vm0, %v47_v9, 0.0 }
  0x94   :  { %50 = vadd.xlane.f32.xlu1 %v49_v11 }
  0x95   :  { %v48_v12 = vmul.f32 %v46_v10, %v46_v10 }
  0x97   :  { %v52_v13 = vsel %vm35_vm0, %v48_v12, 0.0 }
  0x98   :  { %53 = vadd.xlane.f32.xlu1 %v52_v13 }
 0x11d   :  { %v51_v18 = vpop.xlane.xlu1 %50 }
 0x11e   :  { %v55_v19 = vmul.f32 0.03125, %v51_v18 }
 0x120   :  { %v57_v20 = vadd.f32 1e-05, %v55_v19 }
 0x121   :  { %v54_v21 = vpop.xlane.xlu1 %53 }
 0x122   :  { %1581 = vrsqrt.f32 %v57_v20  ;;  %v56_v22 = vmul.f32 0.03125, %v54_v21 }
 0x124   :  { %v58_v23 = vadd.f32 1e-05, %v56_v22 }
 0x126   :  { %1583 = vrsqrt.f32 %v58_v23 }
 0x12f   :  { %v1582_v24 = vpop.eup %1581 }
 0x130   :  { %v61_v26 = vmul.f32 %v1582_v24, %v45_v6 }
 0x132   :  { %v67_v28 = vmul.f32 %v1336_v25, %v61_v26 }
 0x133   :  { %v1584_v29 = vpop.eup %1583 }
 0x134   :  { %v62_v30 = vmul.f32 %v1584_v29, %v46_v10  ;;  %v73_v31 = vadd.f32 %v1337_v27, %v67_v28 }
 0x136   :  { %v68_v32 = vmul.f32 %v1336_v25, %v62_v30  ;;  %1449 = vmatprep.mubr.msk.f32.mxu1 %vm35_vm0, %v73_v31 }
 0x138   :  { %v74_v33 = vadd.f32 %v1337_v27, %v68_v32 }
 0x13a   :  { %1450 = vmatmul.mubr.msk.f32.vlgmr.msra.gmra.mxu1 %vm35_vm0, %v74_v33 }
 0x1fa   :  { %v1736_v34 = vpop.f32.mrf.mxu1 }
 0x1fb   :  { %164 = vrot.lane.b32.xlu0 %v1736_v34, %s1647_s2 }
 0x1fc   :  { %v1739_v35 = vpop.f32.mrf.mxu1 }
 0x1fd   :  { %162 = vrot.lane.b32.xlu1 %v1739_v35, %s1647_s2  ;;  %1456 = vmatprep.mubr.msk.f32.mxu1 %vm166_vm1, %v1739_v35 }
 0x1ff   :  { %360 = vrot.lane.b32.xlu0 %v1739_v35, %s1648_s12 }
 0x201   :  { %366 = vrot.lane.b32.xlu1 %v1736_v34, %s1649_s13 }
 0x203   :  { %362 = vrot.lane.b32.xlu0 %v1736_v34, %s1648_s12 }
 0x205   :  { %364 = vrot.lane.b32.xlu1 %v1739_v35, %s1649_s13 }
 0x207   :  { %560 = vrot.lane.b32.xlu0 %v1739_v35, %s1650_s14 }
 0x209   :  { %566 = vrot.lane.b32.xlu1 %v1736_v34, %s1651_s15 }
 0x20b   :  { %671 = vrot.lane.b32.xlu0 %v1736_v34, %s1652_s16 }
 0x20d   :  { %564 = vrot.lane.b32.xlu1 %v1739_v35, %s1651_s15 }
 0x211   :  { %562 = vrot.lane.b32.xlu1 %v1736_v34, %s1650_s14 }
 0x215   :  { %669 = vrot.lane.b32.xlu1 %v1739_v35, %s1652_s16 }
 0x26d   :  { %v165_v36 = vpop.permute.xlu0 %164 }
 0x26e   :  { %1452 = vmatprep.subr.msk.mxu1 %vm166_vm1, %v165_v36 }
 0x26f   :  { %1453 = vmatpush3.xpose.msk.msra.mxu1 %vm166_vm1, %v165_v36  ;;  %v163_v37 = vpop.permute.xlu1 %162 }
 0x270   :  { %1454 = vmatprep.subr.msk.mxu1 %vm166_vm1, %v163_v37 }
 0x271   :  { %v361_v38 = vpop.permute.xlu0 %360 }
 0x273   :  { %1455 = vmatpush3.xpose.msk.msra.mxu1 %vm166_vm1, %v163_v37  ;;  %v367_v39 = vpop.permute.xlu1 %366 }
 0x274   :  { %1466 = vmatprep.subr.msk.mxu1 %vm166_vm1, %v367_v39 }
 0x275   :  { %v363_v40 = vpop.permute.xlu0 %362 }
 0x276   :  { %1457 = vmatmul.mubr.msk.f32.vlgmr.msra.gmra.mxu1 %vm166_vm1, %v1736_v34 }
 0x277   :  { %v365_v41 = vpop.permute.xlu1 %364  ;;  %1467 = vmatpush3.xpose.msk.msra.mxu1 %vm166_vm1, %v367_v39  ;;  %1470 = vmatprep.mubr.msk.f32.mxu1 %vm166_vm1, %v361_v38 }
 0x278   :  { %1468 = vmatprep.subr.msk.mxu1 %vm166_vm1, %v365_v41 }
 0x279   :  { %v561_v43 = vpop.permute.xlu0 %560 }
 0x27b   :  { %v567_v42 = vpop.permute.xlu1 %566  ;;  %1469 = vmatpush3.xpose.msk.msra.mxu1 %vm166_vm1, %v365_v41 }
 0x27c   :  { %1480 = vmatprep.subr.msk.mxu1 %vm166_vm1, %v567_v42 }
 0x27d   :  { %v672_v45 = vpop.permute.xlu0 %671 }
 0x27e   :  { %1471 = vmatmul.mubr.msk.f32.vlgmr.msra.gmra.mxu1 %vm166_vm1, %v363_v40 }
 0x27f   :  { %v565_v44 = vpop.permute.xlu1 %564  ;;  %1481 = vmatpush3.xpose.msk.msra.mxu1 %vm166_vm1, %v567_v42  ;;  %1484 = vmatprep.mubr.msk.f32.mxu1 %vm166_vm1, %v561_v43 }
 0x280   :  { %1482 = vmatprep.subr.msk.mxu1 %vm166_vm1, %v565_v44 }
 0x283   :  { %v563_v46 = vpop.permute.xlu1 %562  ;;  %1483 = vmatpush3.xpose.msk.msra.mxu1 %vm166_vm1, %v565_v44 }
 0x284   :  { %1487 = vmatprep.subr.mxu1 %v672_v45 }
 0x286   :  { %1485 = vmatmul.mubr.msk.f32.vlgmr.msra.gmra.mxu1 %vm166_vm1, %v563_v46 }
 0x287   :  { %v670_v47 = vpop.permute.xlu1 %669  ;;  %1488 = vmatpush3.msra.mxu1 %v672_v45 }
 0x288   :  { %1489 = vmatprep.subr.mxu1 %v670_v47 }
 0x289   :  { %1490 = vmatpush3.msra.mxu1 %v670_v47 }
 0x336   :  { %v1458_v48 = vpop.f32.mrf.mxu1 }
 0x337   :  { %v247_v60 = vadd.f32 %v1458_v48, %v1775_v52 }
 0x338   :  { %v241_v49 = vpop.f32.mrf.mxu1 }
 0x339   :  { %v242_v61 = vadd.f32 %v241_v49, %v1781_v55  ;;  %v254_v62 = vsel %vm250_vm2, %v247_v60, -inf }
 0x33b   :  { %v251_v2 = vsel %vm250_vm2, %v242_v61, -inf }
 0x33e   :  { %v1472_v50 = vpop.f32.mrf.mxu1 }
 0x33f   :  { %v448_v3 = vadd.f32 %v1472_v50, %v1775_v52 }
 0x340   :  { %v442_v51 = vpop.f32.mrf.mxu1 }
 0x341   :  { %v443_v63 = vadd.f32 %v442_v51, %v1781_v55  ;;  %v454_v5 = vsel %vm250_vm2, %v448_v3, -inf }
 0x343   :  { %v451_v4 = vsel %vm250_vm2, %v443_v63, -inf }
 0x346   :  { %v1486_v53 = vpop.f32.mrf.mxu1 }
 0x347   :  { %v648_v54 = vadd.f32 %v1486_v53, %v1775_v52 }
 0x348   :  { %v642_v56 = vpop.f32.mrf.mxu1 }
 0x349   :  { %v643_v57 = vadd.f32 %v642_v56, %v1781_v55  ;;  %v654_v58 = vsel %vm250_vm2, %v648_v54, -inf }
 0x34a   :  { %655 = vmax.xlane.f32.xlu1 %v654_v58 }
 0x34b   :  { %v651_v59 = vsel %vm250_vm2, %v643_v57, -inf }
 0x34c   :  { %652 = vmax.xlane.f32.xlu0 %v651_v59 }
 0x35b   :  { %764 = vrot.lane.b32.xlu1 %v1739_v35, %s1653_s21 }
 0x35f   :  { %762 = vrot.lane.b32.xlu1 %v1736_v34, %s1654_s22 }
 0x362   :  { %766 = vrot.lane.b32.xlu0 %v1736_v34, %s1653_s21 }
 0x366   :  { %760 = vrot.lane.b32.xlu0 %v1739_v35, %s1654_s22 }
 0x383   :  { %255 = vmax.xlane.f32.xlu1 %v254_v62 }
 0x385   :  { %252 = vmax.xlane.f32.xlu0 %v251_v2 }
 0x389   :  { %452 = vmax.xlane.f32.xlu0 %v451_v4 }
 0x38d   :  { %455 = vmax.xlane.f32.xlu0 %v454_v5 }
 0x394   :  { %269 = vrot.lane.b32.xlu1 %v1739_v35, %s1655_s23 }
 0x398   :  { %471 = vrot.lane.b32.xlu1 %v1736_v34, %s1656_s24 }
 0x39c   :  { %469 = vrot.lane.b32.xlu1 %v1739_v35, %s1656_s24 }
 0x3a3   :  { %271 = vrot.lane.b32.xlu0 %v1736_v34, %s1655_s23 }
 0x3d3   :  { %v656_v6 = vpop.xlane.xlu1 %655 }
 0x3d4   :  { %v658_v7 = vsub.f32 %v648_v54, %v656_v6 }
 0x3d5   :  { %v653_v8 = vpop.xlane.xlu0 %652 }
 0x3d6   :  { %v657_v9 = vsub.f32 %v643_v57, %v653_v8  ;;  %v661_v10 = vmul.f32 1.442695, %v658_v7 }
 0x3d7   :  { %v765_v16 = vpop.permute.xlu1 %764 }
 0x3d8   :  { %v659_v11 = vmul.f32 1.442695, %v657_v9 }
 0x3d9   :  { %v767_v12 = vpop.permute.xlu0 %766 }
 0x3da   :  { %1585 = vpow2.f32 %v659_v11  ;;  %1494 = vmatprep.subr.msk.mxu1 %vm166_vm1, %v767_v12 }
 0x3db   :  { %1587 = vpow2.f32 %v661_v10  ;;  %v763_v17 = vpop.permute.xlu1 %762 }
 0x3dd   :  { %v761_v15 = vpop.permute.xlu0 %760 }
 0x3e7   :  { %v1803_v13 = vpop.eup %1585 }
 0x3e8   :  { %v1805_v14 = vpop.eup %1587  ;;  %1491 = vmatprep.mubr.msk.f32.mxu1 %vm250_vm2, %v1803_v13  ;;  %v663_v50 = vsel %vm250_vm2, %v1803_v13, 0.0 }
 0x3e9   :  { %1492 = vmatmul.mubr.msk.f32.vlgmr.msra.gmra.mxu1 %vm250_vm2, %v1805_v14  ;;  %v666_v51 = vsel %vm250_vm2, %v1805_v14, 0.0 }
 0x3ea   :  { %1495 = vmatpush3.xpose.msk.msra.mxu1 %vm166_vm1, %v767_v12  ;;  %1498 = vmatprep.mubr.msk.f32.mxu1 %vm166_vm1, %v761_v15 }
 0x3eb   :  { %1496 = vmatprep.subr.msk.mxu1 %vm166_vm1, %v765_v16 }
 0x3ee   :  { %1497 = vmatpush3.xpose.msk.msra.mxu1 %vm166_vm1, %v765_v16 }
 0x3f1   :  { %1499 = vmatmul.mubr.msk.f32.vlgmr.msra.gmra.mxu1 %vm166_vm1, %v763_v17 }
 0x40c   :  { %v256_v18 = vpop.xlane.xlu1 %255 }
 0x40d   :  { %v258_v19 = vsub.f32 %v247_v60, %v256_v18  ;;  %v994_v18 = vld [vmem:[%s1966_s3 + $0x18] sm:$0xff] }
 0x40e   :  { %v253_v20 = vpop.xlane.xlu0 %252 }
 0x40f   :  { %v257_v21 = vsub.f32 %v242_v61, %v253_v20  ;;  %v261_v22 = vmul.f32 1.442695, %v258_v19  ;;  %v993_v19 = vld [vmem:[%s1966_s3 + $0x10] sm:$0xff] }
 0x410   :  { %v270_v28 = vpop.permute.xlu1 %269 }
 0x411   :  { %v259_v23 = vmul.f32 1.442695, %v257_v21 }
 0x412   :  { %v453_v24 = vpop.xlane.xlu0 %452 }
 0x413   :  { %1589 = vpow2.f32 %v259_v23  ;;  %v457_v25 = vsub.f32 %v443_v63, %v453_v24  ;;  %v991_v23 = vld [vmem:[%s1966_s3] sm:$0xff] }
 0x414   :  { %1591 = vpow2.f32 %v261_v22  ;;  %v472_v32 = vpop.permute.xlu1 %471  ;;  %v992_v22 = vld [vmem:[%s1966_s3 + $0x8] sm:$0xff] }
 0x415   :  { %v459_v26 = vmul.f32 1.442695, %v457_v25 }
 0x416   :  { %v456_v27 = vpop.xlane.xlu0 %455 }
 0x417   :  { %1593 = vpow2.f32 %v459_v26  ;;  %v458_v29 = vsub.f32 %v448_v3, %v456_v27 }
 0x418   :  { %v470_v37 = vpop.permute.xlu1 %469 }
 0x419   :  { %v461_v30 = vmul.f32 1.442695, %v458_v29 }
 0x41a   :  { %v272_v31 = vpop.permute.xlu0 %271 }
 0x41b   :  { %1595 = vpow2.f32 %v461_v30  ;;  %1459 = vmatprep.subr.mxu0 %v272_v31 }
 0x41c   :  { %1460 = vmatpush3.msra.mxu0 %v272_v31 }
 0x41d   :  { %1461 = vmatprep.subr.mxu0 %v270_v28 }
 0x41e   :  { %1462 = vmatpush3.msra.mxu0 %v270_v28 }
 0x41f   :  { %1473 = vmatprep.subr.mxu0 %v472_v32 }
 0x420   :  { %v1590_v33 = vpop.eup %1589 }
 0x421   :  { %v1592_v36 = vpop.eup %1591  ;;  %1463 = vmatprep.mubr.msk.f32.mxu0 %vm250_vm2, %v1590_v33  ;;  %v263_v63 = vsel %vm250_vm2, %v1590_v33, 0.0 }
 0x422   :  { %1464 = vmatmul.mubr.msk.f32.vlgmr.msra.gmra.mxu0 %vm250_vm2, %v1592_v36  ;;  %v266_v62 = vsel %vm250_vm2, %v1592_v36, 0.0 }
 0x423   :  { %1474 = vmatpush3.msra.mxu0 %v472_v32 }
 0x424   :  { %v1594_v38 = vpop.eup %1593  ;;  %1475 = vmatprep.subr.mxu0 %v470_v37 }
 0x425   :  { %1476 = vmatpush3.msra.mxu0 %v470_v37  ;;  %1477 = vmatprep.mubr.msk.f32.mxu0 %vm250_vm2, %v1594_v38  ;;  %v463_v49 = vsel %vm250_vm2, %v1594_v38, 0.0 }
 0x428   :  { %v1596_v39 = vpop.eup %1595 }
 0x429   :  { %1478 = vmatmul.mubr.msk.f32.vlgmr.msra.gmra.mxu0 %vm250_vm2, %v1596_v39  ;;  %v466_v48 = vsel %vm250_vm2, %v1596_v39, 0.0 }
 0x4a9   :  { %v1820_v40 = vpop.f32.mrf.mxu1 }
 0x4ab   :  { %v1822_v41 = vpop.f32.mrf.mxu1 }
 0x4b1   :  { %v1500_v42 = vpop.f32.mrf.mxu1 }
 0x4b2   :  { %v848_v43 = vadd.f32 %v1500_v42, %v1775_v52 }
 0x4b3   :  { %v842_v44 = vpop.f32.mrf.mxu1 }
 0x4b4   :  { %v843_v45 = vadd.f32 %v842_v44, %v1781_v55  ;;  %v854_v46 = vsel %vm250_vm2, %v848_v43, -inf }
 0x4b5   :  { %855 = vmax.xlane.f32.xlu1 %v854_v46 }
 0x4b6   :  { %v851_v47 = vsel %vm250_vm2, %v843_v45, -inf }
 0x4b7   :  { %852 = vmax.xlane.f32.xlu0 %v851_v47 }
 0x4c6   :  { %869 = vrot.lane.b32.xlu1 %v1739_v35, %s1657_s0 }
 0x4cd   :  { %871 = vrot.lane.b32.xlu0 %v1736_v34, %s1657_s0 }
 0x4e2   :  { %v1465_v4 = vpop.f32.mrf.mxu0 }
 0x4e4   :  { %v347_v6 = vpop.f32.mrf.mxu0 }
 0x4e9   :  { %v1479_v8 = vpop.f32.mrf.mxu0 }
 0x4ea   :  { %467 = vadd.xlane.f32.xlu1 %v466_v48 }
 0x4eb   :  { %v547_v12 = vpop.f32.mrf.mxu0 }
 0x4ec   :  { %464 = vadd.xlane.f32.xlu0 %v463_v49 }
 0x4f0   :  { %664 = vadd.xlane.f32.xlu0 %v663_v50  ;;  %v1366_v50 = vld [vmem:[%s1964_s1 + $0x2] ss:$0 sm:$0xff] }
 0x4f4   :  { %667 = vadd.xlane.f32.xlu0 %v666_v51 }
 0x53e   :  { %v856_v52 = vpop.xlane.xlu1 %855 }
 0x53f   :  { %v858_v53 = vsub.f32 %v848_v43, %v856_v52 }
 0x540   :  { %v853_v54 = vpop.xlane.xlu0 %852 }
 0x541   :  { %v861_v35 = vmul.f32 1.442695, %v858_v53  ;;  %v857_v55 = vsub.f32 %v843_v45, %v853_v54 }
 0x542   :  { %v870_v57 = vpop.permute.xlu1 %869 }
 0x543   :  { %1597 = vpow2.f32 %v861_v35  ;;  %v859_v34 = vmul.f32 1.442695, %v857_v55 }
 0x544   :  { %v872_v56 = vpop.permute.xlu0 %871 }
 0x545   :  { %1599 = vpow2.f32 %v859_v34  ;;  %1501 = vmatprep.subr.mxu0 %v872_v56 }
 0x546   :  { %1502 = vmatpush3.msra.mxu0 %v872_v56 }
 0x547   :  { %1503 = vmatprep.subr.mxu0 %v870_v57 }
 0x548   :  { %1504 = vmatpush3.msra.mxu0 %v870_v57 }
 0x549   :  { %1508 = vmatprep.subr.mxu0 %v994_v18 }
 0x550   :  { %v1598_v58 = vpop.eup %1597 }
 0x551   :  { %v866_v59 = vsel %vm250_vm2, %v1598_v58, 0.0 }
 0x552   :  { %v1600_v60 = vpop.eup %1599  ;;  %867 = vadd.xlane.f32.xlu1 %v866_v59 }
 0x553   :  { %1505 = vmatprep.mubr.msk.f32.mxu0 %vm250_vm2, %v1600_v60  ;;  %v863_v61 = vsel %vm250_vm2, %v1600_v60, 0.0 }
 0x554   :  { %864 = vadd.xlane.f32.xlu0 %v863_v61  ;;  %1506 = vmatmul.mubr.msk.f32.vlgmr.msra.gmra.mxu0 %vm250_vm2, %v1598_v58 }
 0x555   :  { %1509 = vmatpush3.msra.mxu0 %v994_v18 }
 0x556   :  { %267 = vadd.xlane.f32.xlu1 %v266_v62  ;;  %1510 = vmatprep.subr.mxu0 %v993_v19 }
 0x557   :  { %1511 = vmatpush3.msra.mxu0 %v993_v19  ;;  %v1368_v19 = vld [vmem:[%s1964_s1 + $0x4] ss:$0 sm:$0xff] }
 0x558   :  { %264 = vadd.xlane.f32.xlu0 %v263_v63  ;;  %1512 = vmatprep.subr.mxu0 %v992_v22 }
 0x559   :  { %1513 = vmatpush3.msra.mxu0 %v992_v22 }
 0x55a   :  { %1514 = vmatprep.subr.mxu0 %v991_v23 }
 0x55b   :  { %1515 = vmatpush3.msra.mxu0 %v991_v23 }
 0x573   :  { %v468_v2 = vpop.xlane.xlu1 %467 }
 0x574   :  { %1601 = vrcp.f32 %v468_v2 }
 0x575   :  { %v465_v3 = vpop.xlane.xlu0 %464 }
 0x576   :  { %1603 = vrcp.f32 %v465_v3  ;;  %v1125_v3 = vld [vmem:[%s1967_s4 + $0x18] sm:$0xff] }
 0x577   :  { %1519 = vmatprep.subr.mxu1 %v1125_v3 }
 0x578   :  { %1520 = vmatpush3.msra.mxu1 %v1125_v3 }
 0x579   :  { %v665_v5 = vpop.xlane.xlu0 %664 }
 0x57a   :  { %1605 = vrcp.f32 %v665_v5  ;;  %v1123_v5 = vld [vmem:[%s1967_s4 + $0x8] sm:$0xff] }
 0x57d   :  { %v668_v7 = vpop.xlane.xlu0 %667 }
 0x57e   :  { %1607 = vrcp.f32 %v668_v7  ;;  %v1236_v7 = vld [vmem:[%s1968_s5 + $0x78] sm:$0xff] }
 0x57f   :  { %1530 = vmatprep.subr.mxu0 %v1236_v7 }
 0x581   :  { %v1602_v9 = vpop.eup %1601 }
 0x582   :  { %v559_v10 = vmul.f32 %v1602_v9, %v1479_v8  ;;  %v1235_v8 = vld [vmem:[%s1968_s5 + $0x70] sm:$0xff]  ;;  %v1234_v9 = vld [vmem:[%s1968_s5 + $0x68] sm:$0xff] }
 0x583   :  { %v1604_v11 = vpop.eup %1603 }
 0x584   :  { %964 = vrot.lane.b32.xlu1 %v559_v10, %s1658_s25  ;;  %v557_v13 = vmul.f32 %v1604_v11, %v547_v12 }
 0x586   :  { %962 = vrot.lane.b32.xlu0 %v557_v13, %s1658_s25 }
 0x587   :  { %v1606_v14 = vpop.eup %1605 }
 0x588   :  { %v757_v15 = vmul.f32 %v1606_v14, %v1822_v41 }
 0x58a   :  { %970 = vrot.lane.b32.xlu1 %v757_v15, %s1659_s26 }
 0x58b   :  { %v1608_v16 = vpop.eup %1607 }
 0x58c   :  { %v759_v17 = vmul.f32 %v1608_v16, %v1820_v40 }
 0x58e   :  { %972 = vrot.lane.b32.xlu1 %v759_v17, %s1659_s26  ;;  %v1367_v17 = vld [vmem:[%s1964_s1 + $0x3] ss:$0 sm:$0xff] }
 0x5db   :  { %v868_v20 = vpop.xlane.xlu1 %867 }
 0x5dc   :  { %1609 = vrcp.f32 %v868_v20 }
 0x5dd   :  { %v865_v21 = vpop.xlane.xlu0 %864 }
 0x5de   :  { %1611 = vrcp.f32 %v865_v21 }
 0x5df   :  { %v268_v31 = vpop.xlane.xlu1 %267 }
 0x5e1   :  { %v265_v30 = vpop.xlane.xlu0 %264 }
 0x5e2   :  { %1613 = vrcp.f32 %v265_v30  ;;  %v1229_v30 = vld [vmem:[%s1968_s5 + $0x40] sm:$0xff] }
 0x5e3   :  { %1615 = vrcp.f32 %v268_v31  ;;  %v1228_v31 = vld [vmem:[%s1968_s5 + $0x38] sm:$0xff] }
 0x5e9   :  { %v1610_v24 = vpop.eup %1609 }
 0x5eb   :  { %v1612_v27 = vpop.eup %1611 }
 0x5ef   :  { %v1614_v36 = vpop.eup %1613 }
 0x5f0   :  { %v1616_v37 = vpop.eup %1615  ;;  %v357_v40 = vmul.f32 %v1614_v36, %v347_v6  ;;  %v1122_v6 = vld [vmem:[%s1967_s4] sm:$0xff] }
 0x5f1   :  { %v359_v41 = vmul.f32 %v1616_v37, %v1465_v4  ;;  %v1124_v4 = vld [vmem:[%s1967_s4 + $0x10] sm:$0xff]  ;;  %v1225_v36 = vld [vmem:[%s1968_s5 + $0x20] sm:$0xff]  ;;  %v1224_v37 = vld [vmem:[%s1968_s5 + $0x18] sm:$0xff] }
 0x5f2   :  { %1521 = vmatprep.subr.mxu1 %v1124_v4 }
 0x5f3   :  { %1522 = vmatpush3.msra.mxu1 %v1124_v4 }
 0x5f4   :  { %1523 = vmatprep.subr.mxu1 %v1123_v5 }
 0x5f5   :  { %1524 = vmatpush3.msra.mxu1 %v1123_v5 }
 0x5f6   :  { %v965_v32 = vpop.permute.xlu1 %964  ;;  %1525 = vmatprep.subr.mxu1 %v1122_v6 }
 0x5f7   :  { %v985_v44 = vsel %vm166_vm1, %v359_v41, %v965_v32  ;;  %1526 = vmatpush3.msra.mxu1 %v1122_v6  ;;  %v1227_v32 = vld [vmem:[%s1968_s5 + $0x30] sm:$0xff]  ;;  %v1369_v41 = vld [vmem:[%s1964_s1 + $0x5] ss:$0 sm:$0xff] }
 0x5f8   :  { %v963_v39 = vpop.permute.xlu0 %962 }
 0x5f9   :  { %v984_v42 = vsel %vm166_vm1, %v357_v40, %v963_v39  ;;  %v1222_v39 = vld [vmem:[%s1968_s5 + $0x8] sm:$0xff]  ;;  %v1221_v40 = vld [vmem:[%s1968_s5] sm:$0xff] }
 0x5fc   :  { %v971_v33 = vpop.permute.xlu1 %970 }
 0x5fd   :  { %v986_v45 = vsel %vm250_vm2, %v984_v42, %v971_v33  ;;  %v1226_v33 = vld [vmem:[%s1968_s5 + $0x28] sm:$0xff] }
 0x600   :  { %v973_v38 = vpop.permute.xlu1 %972 }
 0x601   :  { %v987_v47 = vsel %vm250_vm2, %v985_v44, %v973_v38  ;;  %v1223_v38 = vld [vmem:[%s1968_s5 + $0x10] sm:$0xff] }
 0x614   :  { %v1507_v25 = vpop.f32.mrf.mxu0 }
 0x615   :  { %v959_v26 = vmul.f32 %v1610_v24, %v1507_v25 }
 0x616   :  { %v947_v28 = vpop.f32.mrf.mxu0 }
 0x617   :  { %v957_v29 = vmul.f32 %v1612_v27, %v947_v28  ;;  %980 = vrot.lane.b32.xlu1 %v959_v26, %s1660_s11  ;;  %v1233_v26 = vld [vmem:[%s1968_s5 + $0x60] sm:$0xff]  ;;  %v1232_v27 = vld [vmem:[%s1968_s5 + $0x58] sm:$0xff]  ;;  %v1231_v28 = vld [vmem:[%s1968_s5 + $0x50] sm:$0xff] }
 0x619   :  { %978 = vrot.lane.b32.xlu0 %v957_v29, %s1660_s11  ;;  %v1230_v29 = vld [vmem:[%s1968_s5 + $0x48] sm:$0xff] }
 0x689   :  { %v981_v43 = vpop.permute.xlu1 %980 }
 0x68a   :  { %v990_v49 = vsel %vm988_vm3, %v987_v47, %v981_v43 }
 0x68b   :  { %v979_v46 = vpop.permute.xlu0 %978 }
 0x68c   :  { %v989_v48 = vsel %vm988_vm3, %v986_v45, %v979_v46 }
 0x68d   :  { %1516 = vmatprep.mubr.msk.f32.mxu0 %vm35_vm0, %v989_v48 }
 0x68e   :  { %1517 = vmatmul.mubr.msk.f32.vlgmr.msra.gmra.mxu0 %vm35_vm0, %v990_v49 }
 0x68f   :  { %1531 = vmatpush3.msra.mxu0 %v1236_v7 }
 0x690   :  { %1532 = vmatprep.subr.mxu0 %v1235_v8 }
 0x691   :  { %1533 = vmatpush3.msra.mxu0 %v1235_v8 }
 0x692   :  { %1534 = vmatprep.subr.mxu0 %v1234_v9 }
 0x693   :  { %1535 = vmatpush3.msra.mxu0 %v1234_v9 }
 0x694   :  { %1536 = vmatprep.subr.mxu0 %v1233_v26 }
 0x695   :  { %1537 = vmatpush3.msra.mxu0 %v1233_v26 }
 0x696   :  { %1538 = vmatprep.subr.mxu0 %v1232_v27 }
 0x697   :  { %1539 = vmatpush3.msra.mxu0 %v1232_v27 }
 0x698   :  { %1540 = vmatprep.subr.mxu0 %v1231_v28 }
 0x699   :  { %1541 = vmatpush3.msra.mxu0 %v1231_v28 }
 0x69a   :  { %1542 = vmatprep.subr.mxu0 %v1230_v29 }
 0x69b   :  { %1543 = vmatpush3.msra.mxu0 %v1230_v29 }
 0x69c   :  { %1544 = vmatprep.subr.mxu0 %v1229_v30 }
 0x69d   :  { %1545 = vmatpush3.msra.mxu0 %v1229_v30 }
 0x69e   :  { %1546 = vmatprep.subr.mxu0 %v1228_v31 }
 0x69f   :  { %1547 = vmatpush3.msra.mxu0 %v1228_v31 }
 0x6a0   :  { %1548 = vmatprep.subr.mxu0 %v1227_v32 }
 0x6a1   :  { %1549 = vmatpush3.msra.mxu0 %v1227_v32 }
 0x6a2   :  { %1550 = vmatprep.subr.mxu0 %v1226_v33 }
 0x6a3   :  { %1551 = vmatpush3.msra.mxu0 %v1226_v33 }
 0x6a4   :  { %1552 = vmatprep.subr.mxu0 %v1225_v36 }
 0x6a5   :  { %1553 = vmatpush3.msra.mxu0 %v1225_v36 }
 0x6a6   :  { %1554 = vmatprep.subr.mxu0 %v1224_v37 }
 0x6a7   :  { %1555 = vmatpush3.msra.mxu0 %v1224_v37 }
 0x6a8   :  { %1556 = vmatprep.subr.mxu0 %v1223_v38 }
 0x6a9   :  { %1557 = vmatpush3.msra.mxu0 %v1223_v38 }
 0x6aa   :  { %1558 = vmatprep.subr.mxu0 %v1222_v39 }
 0x6ab   :  { %1559 = vmatpush3.msra.mxu0 %v1222_v39 }
 0x6ac   :  { %1560 = vmatprep.subr.mxu0 %v1221_v40 }
 0x6ad   :  { %1561 = vmatpush3.msra.mxu0 %v1221_v40 }
 0x74e   :  { %v1518_v51 = vpop.f32.mrf.mxu0 }
 0x74f   :  { %v1077_v52 = vadd.f32 %v1518_v51, %v1706_v1 }
 0x750   :  { %v1067_v53 = vpop.f32.mrf.mxu0 }
 0x751   :  { %v1868_v54 = vadd.f32 %v1366_v50, %v1077_v52  ;;  %v1076_v35 = vadd.f32 %v1067_v53, %v1701_v0 }
 0x753   :  { %v1871_v55 = vadd.f32 %v1366_v50, %v1076_v35  ;;  %v1087_v34 = vsel %vm35_vm0, %v1868_v54, 0.0 }
 0x754   :  { %1088 = vadd.xlane.f32.xlu1 %v1087_v34 }
 0x755   :  { %v1084_v56 = vsel %vm35_vm0, %v1871_v55, 0.0 }
 0x756   :  { %1085 = vadd.xlane.f32.xlu0 %v1084_v56  ;;  %v1372_v56 = vld [vmem:[%s1964_s1 + $0x6] ss:$0 sm:$0xff] }
 0x7dd   :  { %v1089_v57 = vpop.xlane.xlu1 %1088 }
 0x7de   :  { %v1091_v58 = vmul.f32 0.03125, %v1089_v57 }
 0x7df   :  { %v1086_v59 = vpop.xlane.xlu0 %1085 }
 0x7e0   :  { %v1090_v60 = vmul.f32 0.03125, %v1086_v59  ;;  %v1093_v1 = vsub.f32 %v1868_v54, %v1091_v58 }
 0x7e2   :  { %v1092_v61 = vsub.f32 %v1871_v55, %v1090_v60  ;;  %v1095_v63 = vmul.f32 %v1093_v1, %v1093_v1 }
 0x7e4   :  { %v1094_v62 = vmul.f32 %v1092_v61, %v1092_v61  ;;  %v1099_v2 = vsel %vm35_vm0, %v1095_v63, 0.0 }
 0x7e6   :  { %v1096_v0 = vsel %vm35_vm0, %v1094_v62, 0.0 }
 0x7e7   :  { %1097 = vadd.xlane.f32.xlu0 %v1096_v0 }
 0x7eb   :  { %1100 = vadd.xlane.f32.xlu0 %v1099_v2 }
 0x870   :  { %v1098_v10 = vpop.xlane.xlu0 %1097 }
 0x871   :  { %v1102_v11 = vmul.f32 0.03125, %v1098_v10 }
 0x873   :  { %v1104_v12 = vadd.f32 1e-05, %v1102_v11 }
 0x874   :  { %v1101_v13 = vpop.xlane.xlu0 %1100 }
 0x875   :  { %1617 = vrsqrt.f32 %v1104_v12  ;;  %v1103_v14 = vmul.f32 0.03125, %v1101_v13 }
 0x877   :  { %v1105_v15 = vadd.f32 1e-05, %v1103_v14 }
 0x879   :  { %1619 = vrsqrt.f32 %v1105_v15 }
 0x882   :  { %v1618_v16 = vpop.eup %1617 }
 0x883   :  { %v1108_v18 = vmul.f32 %v1618_v16, %v1092_v61 }
 0x885   :  { %v1114_v20 = vmul.f32 %v1367_v17, %v1108_v18 }
 0x886   :  { %v1620_v21 = vpop.eup %1619 }
 0x887   :  { %v1109_v22 = vmul.f32 %v1620_v21, %v1093_v1  ;;  %v1120_v23 = vadd.f32 %v1368_v19, %v1114_v20 }
 0x889   :  { %v1115_v24 = vmul.f32 %v1367_v17, %v1109_v22  ;;  %1527 = vmatprep.mubr.msk.f32.mxu1 %vm35_vm0, %v1120_v23 }
 0x88b   :  { %v1121_v25 = vadd.f32 %v1368_v19, %v1115_v24 }
 0x88d   :  { %1528 = vmatmul.mubr.msk.f32.vlgmr.msra.gmra.mxu1 %vm35_vm0, %v1121_v25 }
 0x94d   :  { %v1529_v42 = vpop.f32.mrf.mxu1 }
 0x94e   :  { %v1208_v43 = vadd.f32 %v1529_v42, %v1369_v41 }
 0x94f   :  { %v1202_v44 = vpop.f32.mrf.mxu1 }
 0x950   :  { %v1214_v45 = vmul.f32 0.70710677, %v1208_v43  ;;  %v1203_v46 = vadd.f32 %v1369_v41, %v1202_v44  ;;  %v1212_v53 = vmul.f32 0.5, %v1208_v43 }
 0x952   :  { %1621 = verf.f32 %v1214_v45  ;;  %v1213_v47 = vmul.f32 0.70710677, %v1203_v46  ;;  %v1211_v51 = vmul.f32 0.5, %v1203_v46 }
 0x954   :  { %1623 = verf.f32 %v1213_v47 }
 0x95f   :  { %v1622_v48 = vpop.eup %1621 }
 0x960   :  { %v1218_v50 = vadd.f32 1.0, %v1622_v48 }
 0x961   :  { %v1624_v49 = vpop.eup %1623 }
 0x962   :  { %v1217_v52 = vadd.f32 1.0, %v1624_v49  ;;  %v1220_v34 = vmul.f32 %v1218_v50, %v1212_v53 }
 0x964   :  { %v1219_v35 = vmul.f32 %v1217_v52, %v1211_v51 }
 0x966   :  { %1562 = vmatprep.mubr.f32.mxu0 %v1219_v35 }
 0x967   :  { %1563 = vmatmul.mubr.f32.vlgmr.msra.gmra.mxu0 %v1220_v34 }
 0xa27   :  { %v1564_v57 = vpop.f32.mrf.mxu0 }
 0xa28   :  { %v1313_v58 = vadd.f32 %v1564_v57, %v1372_v56 }
 0xa29   :  { %v1307_v59 = vpop.f32.mrf.mxu0 }
 0xa2a   :  { %v1317_v60 = vadd.f32 %v1313_v58, %v1868_v54  ;;  %v1308_v1 = vadd.f32 %v1372_v56, %v1307_v59 }
 0xa2c   :  { %1319 = vst.msk [vmem:[#allocation2 + $0x8] sm:$0xff] %vm35_vm0, %v1317_v60  ;;  %v1316_v61 = vadd.f32 %v1308_v1, %v1871_v55 }
 0xa2e   :  { %1318 = vst.msk [vmem:[#allocation2] sm:$0xff] %vm35_vm0, %v1316_v61 }
 0xa2f   :  { %1636 = shalt.err (!%p1633_p4)
}
 0xa30   :  { %s1662_s1 = smov 128  }
 0xa31   :  { %1331 = dma.vmem_to_hbm [thread:$0]  %s1326_s8, 256, %s1969_s6, [#allocation3], %s1662_s1, %s1662_s1, %s1658_s25  }
 0xa32   :  { %1645 = dma.done.wait [#allocation3], 256  }
 0xa33   :  { %1646 = vsyncadd [#allocation3], 4294967040 }
 0xa34   :  { %1335 = vsyncpa [#allocation3], 1 }

</bundles_post_ra>
